<compile_context>
chip_gen: v5e
topology: v5e:2x2
jax: 0.10.0
libtpu: 0.0.40
codegen_flags: <defaults>
</compile_context>

<pallas_src>
import functools

import numpy as np
import jax
import jax.numpy as jnp
from jax.experimental import pallas as pl
from jax.experimental.pallas import tpu as pltpu


LANE = 512                     # lane width (multiple of 128 -> unmasked vst)
MAX_TILE_BYTES = 4 << 20       # ~4 MiB per block amortizes per-step overhead
SMALL_FALLBACK_ELEMS = 65536   # below this many elems/sample, use plain XLA
VMEM_LIMIT_BYTES = 32 << 20    # 2 bufs x (in + out) x 4 MiB = 16 MiB << 32 MiB


def _round_up(x: int, m: int) -> int:
    return (x + m - 1) // m * m


def _drop_path_kernel(scale_ref, x_ref, o_ref):
    # scale_ref: (B,) float32 in SMEM (scalar prefetch): 0.0 or 1/keep_prob per sample.
    # x_ref / o_ref: (1, tile_r, LANE) VMEM tiles of the current sample.
    b = pl.program_id(0)
    s = scale_ref[b]  # f32 scalar
    # Multiply in f32, cast on store (exact for f32; avoids scale-rounding error
    # for bf16/fp8 inputs; compute is free relative to HBM DMA).
    o_ref[...] = (x_ref[...].astype(jnp.float32) * s).astype(o_ref.dtype)


@functools.partial(jax.jit, static_argnames=("drop_prob", "use_kernel", "donate_x"))
def _drop_path_train(x, key, *, drop_prob: float, use_kernel: bool, donate_x: bool):
    keep_prob = 1.0 - drop_prob
    B = x.shape[0]
    orig_shape = x.shape
    n = int(np.prod(orig_shape[1:]))

    # Per-sample random keep mask (matches torch reference:
    # floor(keep_prob + U[0,1)) -> {0,1}; output = x/keep_prob * mask).
    u = jax.random.uniform(key, (B,), dtype=jnp.float32)
    keep = jnp.floor(jnp.float32(keep_prob) + u)
    scale = keep * jnp.float32(1.0 / keep_prob)  # (B,) f32: 0 or 1/keep_prob

    if not use_kernel:
        # Small-input fallback: fused XLA broadcast multiply is already at roofline.
        bshape = (B,) + (1,) * (x.ndim - 1)
        return (x.astype(jnp.float32) * scale.reshape(bshape)).astype(x.dtype)

    # --- lane-dense tiling of each flattened sample: (B, r_total, LANE) ---
    itemsize = x.dtype.itemsize
    sublanes = max(8, 32 // itemsize)          # 8 f32 / 16 bf16 / 32 int8-fp8
    r_needed = -(-n // LANE)
    r_total = _round_up(r_needed, sublanes)    # pad only to the sublane tile
    n_pad = r_total * LANE

    # ~4 MiB blocks, dtype-aware row count, multiple of the sublane tile.
    max_tile_r = _round_up(max(MAX_TILE_BYTES // (LANE * itemsize), sublanes), sublanes)
    tile_r = min(r_total, max_tile_r)
    # v7x: with B == 1 make sure the grid has >= 2 steps so both TCs get work.
    if B == 1 and r_total >= 2 * sublanes:
        half = _round_up(-(-r_total // 2), sublanes)
        tile_r = min(tile_r, max(sublanes, half))
    num_r_blocks = pl.cdiv(r_total, tile_r)    # ragged last block is masked by Pallas

    x_flat = x.reshape(B, n)
    if n_pad != n:
        x_flat = jnp.pad(x_flat, ((0, 0), (0, n_pad - n)))
    x3 = x_flat.reshape(B, r_total, LANE)

    out3 = pl.pallas_call(
        _drop_path_kernel,
        out_shape=jax.ShapeDtypeStruct((B, r_total, LANE), x.dtype),
        grid_spec=pltpu.PrefetchScalarGridSpec(
            num_scalar_prefetch=1,
            grid=(B, num_r_blocks),
            in_specs=[
                pl.BlockSpec((1, tile_r, LANE), lambda b, r, scale: (b, r, 0)),
            ],
            out_specs=pl.BlockSpec((1, tile_r, LANE), lambda b, r, scale: (b, r, 0)),
        ),
        compiler_params=pltpu.CompilerParams(
            # No PRNG state, no accumulation: both axes independent -> megacore.
            dimension_semantics=("parallel", "parallel"),
            vmem_limit_bytes=VMEM_LIMIT_BYTES,
        ),
        # x3 is operand index 1 (scalar-prefetch scale is operand 0).
        input_output_aliases=({1: 0} if donate_x else {}),
    )(scale, x3)

    out_flat = out3.reshape(B, n_pad)
    if n_pad != n:
        out_flat = out_flat[:, :n]
    return out_flat.reshape(orig_shape)


def drop_path(x, drop_prob: float = 0.0, training: bool = False, *,
              key=None, seed: int = 0, donate_x: bool = False, force_kernel=None):
    """Pallas implementation of timm/torch-style drop_path (per-sample stochastic depth)."""
    if drop_prob == 0.0 or not training:
        return x
    if drop_prob >= 1.0:
        # keep_prob == 0: torch reference yields NaN (x/0 * 0); we return the
        # well-defined "always dropped" result instead.
        return jnp.zeros_like(x)
    if key is None:
        key = jax.random.PRNGKey(seed)

    n = int(np.prod(x.shape[1:]))
    use_kernel = (n >= SMALL_FALLBACK_ELEMS) if force_kernel is None else bool(force_kernel)
    return _drop_path_train(x, key, drop_prob=float(drop_prob),
                            use_kernel=use_kernel, donate_x=bool(donate_x))


class DropPath:
    """Drop paths (Stochastic Depth) per sample — Pallas/JAX version."""

    def __init__(self, drop_prob=None, seed: int = 0):
        self.drop_prob = drop_prob if drop_prob is not None else 0.0
        self.training = True
        # Internal key advanced per call so repeated calls don't reuse a mask.
        self._key = jax.random.PRNGKey(seed)

    def __call__(self, x, key=None, **kwargs):
        if key is None and self.training and self.drop_prob > 0.0:
            self._key, key = jax.random.split(self._key)
        return drop_path(x, self.drop_prob, self.training, key=key, **kwargs)


if __name__ == "__main__":
    key = jax.random.PRNGKey(0)
    B, C, H, W = 2, 4, 16, 16
    x = jax.random.normal(key, (B, C, H, W), dtype=jnp.float32)

    drop_prob = 0.2
    keep_prob = 1.0 - drop_prob
    mask_key = jax.random.PRNGKey(1234)

    # Pallas kernel path (forced, since this small example is below the
    # small-input fallback threshold).
    out_kernel = jax.block_until_ready(
        drop_path(x, drop_prob, training=True, key=mask_key, force_kernel=True))

    # Plain-XLA fallback path with the same key must match.
    out_ref = jax.block_until_ready(
        drop_path(x, drop_prob, training=True, key=mask_key, force_kernel=False))
    assert bool(jnp.allclose(out_kernel, out_ref, rtol=1e-6, atol=1e-6)), \
        "kernel path disagrees with XLA fallback"

    # Sanity: each sample is either all-zero (dropped) or x / keep_prob (kept).
    for b in range(B):
        ob = out_kernel[b]
        dropped = bool(jnp.all(ob == 0.0))
        kept = bool(jnp.allclose(ob, x[b] / keep_prob, rtol=1e-5, atol=1e-5))
        assert dropped or kept, f"sample {b} is neither dropped nor kept correctly"

    # Module wrapper exercises key-splitting; eval mode / drop_prob=0 -> identity.
    module = DropPath(drop_prob=drop_prob)
    module.training = True
    _ = jax.block_until_ready(module(x))
    module.training = False
    out_eval = jax.block_until_ready(module(x))
    assert bool(jnp.array_equal(out_eval, x))

    print("KERNEL_OK")
</pallas_src>

<mosaic_0001>
module attributes {stable_mosaic.version = 11 : i64} {
  func.func @_drop_path_kernel(%arg0: i32, %arg1: i32, %arg2: memref<2xf32, #tpu.memory_space<smem>>, %arg3: memref<1x8x512xf32, #tpu.memory_space<vmem>>, %arg4: memref<1x8x512xf32, #tpu.memory_space<vmem>>) attributes {dimension_semantics = [#tpu.dimension_semantics<parallel>, #tpu.dimension_semantics<parallel>], iteration_bounds = array<i64: 2, 1>, scalar_prefetch = 1 : i64, scratch_operands = 0 : i64, tpu.core_type = #tpu.core_type<tc>, window_params = [{transform_indices = @transform_0, window_bounds = array<i64: 1, 8, 512>}, {transform_indices = @transform_1, window_bounds = array<i64: 1, 8, 512>}]} {
    %0 = arith.index_cast %arg0 : i32 to index
    %1 = memref.load %arg2[%0] : memref<2xf32, #tpu.memory_space<smem>>
    %c0 = arith.constant 0 : index
    %c0_0 = arith.constant 0 : index
    %c0_1 = arith.constant 0 : index
    %2 = vector.load %arg3[%c0, %c0_0, %c0_1] : memref<1x8x512xf32, #tpu.memory_space<vmem>>, vector<1x8x512xf32>
    %3 = vector.broadcast %1 : f32 to vector<1x8x512xf32>
    %4 = arith.mulf %2, %3 : vector<1x8x512xf32>
    %c0_2 = arith.constant 0 : index
    %c0_3 = arith.constant 0 : index
    %c0_4 = arith.constant 0 : index
    %5 = vector.load %arg4[%c0_2, %c0_3, %c0_4] : memref<1x8x512xf32, #tpu.memory_space<vmem>>, vector<1x8x512xf32>
    tpu.vector_store %arg4[%c0_2, %c0_3, %c0_4], %4 {strides = array<i32>} : memref<1x8x512xf32, #tpu.memory_space<vmem>>, vector<1x8x512xf32>,
    return
  }
  func.func @transform_0(%arg0: i32, %arg1: i32, %arg2: memref<2xf32, #tpu.memory_space<smem>>) -> (i32, i32, i32) {
    %c0_i32 = arith.constant 0 : i32
    %c0_i32_0 = arith.constant 0 : i32
    return %arg0, %arg1, %c0_i32 : i32, i32, i32
  }
  func.func @transform_1(%arg0: i32, %arg1: i32, %arg2: memref<2xf32, #tpu.memory_space<smem>>) -> (i32, i32, i32) {
    %c0_i32 = arith.constant 0 : i32
    %c0_i32_0 = arith.constant 0 : i32
    return %arg0, %arg1, %c0_i32 : i32, i32, i32
  }
}

</mosaic_0001>

<bundles_post_ra>
// kernel: _drop_path_train.1
= control target key start
LH: loop header
LB: loop body
LE: loop exit
PB: predicated region body
PF: predicated region fallthrough
CT: control target
= control target key end

     0   :  { %s344_s12 = smov [#allocation3]   ;;  %s393_s0 = inlined_call_operand.vmem [shape: f32[2], index: 0, kind: input, shape index: {}]   ;;  %s394_s1 = inlined_call_operand.vmem [shape: f32[2,8,512], index: 1, kind: input, shape index: {}]   ;;  %s395_s2 = inlined_call_operand.vmem [shape: f32[2,8,512], index: 2, kind: output, shape index: {}]  }
   0x1   :  { %s8_s11 = sshll.u32 %s393_s0, 4  ;;  %s9_s11 = int_to_ptr.vmem [resolvable:$true] %s8_s11 }
   0x2   :  { %11 = dma.vmem_to_smem %s9_s11, 16, %s344_s12, [#allocation2] }
   0x3   :  { %330 = dma.done.wait [#allocation2], 16 }
   0x4   :  { %331 = vsyncadd [#allocation2], 4294967280 }
   0x5   :  { %14 = sfence }
   0x6   :  { %s363_s13 = smov 0   ;;  %s365_s14 = smov 0  }
   0x7   :  { %s367_s15 = smov 0  }
   0x8 LB: > { %s32_s0 = sadd.s32 1, %s338_s14  ;;  %p272_p0 = scmp.ge.s32.totalorder %s342_s15, 1  ;;  %s342_s15 = sphi %s367_s15, %s20_s15   ;;  %s338_s14 = sphi %s365_s14, %s397_s14   ;;  %s334_s13 = sphi %s363_s13, %s396_s13  }
   0x9   : > { %p34_p1 = scmp.ge.s32.totalorder %s32_s0, 2  ;;  %p116_p2 = scmp.lt.s32.totalorder %s342_s15, 3 }
   0xb   : > { %s399_s0 = smov (%p34_p1, %s32_s0), 0  ;;  %p117_p3 = pnand %p272_p0, %p116_p2 }
   0xc   : > { %p144_p4 = scmp.lt.s32.totalorder (!%p117_p3), %s334_s13, 1  ;;  %s162_s16 = sld [smem:[#allocation3 + %s334_s13]] (!%p117_p3) }
   0xd   : > { %120 = sbr.rel (%p117_p3) target bundleno = 28 (0x1c), region = 24 }
  0x12   : > { %s401_s13 = smov (!%p144_p4, %s334_s13), 1  ;;  %v167_v1 = vstv %s162_s16 }
  0x13   : > { %s279_s17 = sshll.u32 %s401_s13, 5 }
  0x14   : > { %s152_s20 = scalar_lea.vmem %s394_s1, %s279_s17  ;;  %s161_s23 = scalar_lea.vmem %s395_s2, %s279_s17 }
  0x15   : > { %v163_v0 = vld [vmem:[%s152_s20] sm:$0xff]  ;;  %v164_v2 = vld [vmem:[%s152_s20 + $0x8] sm:$0xff]  ;;  %v165_v3 = vld [vmem:[%s152_s20 + $0x10] sm:$0xff] }
  0x16   : > { %v168_v4 = vmul.f32 %v167_v1, %v163_v0  ;;  %v169_v5 = vmul.f32 %v167_v1, %v164_v2  ;;  %v170_v6 = vmul.f32 %v167_v1, %v165_v3  ;;  %v166_v7 = vld [vmem:[%s152_s20 + $0x18] sm:$0xff] }
  0x17   : > { %v171_v8 = vmul.f32 %v167_v1, %v166_v7 }
  0x18   : > { %172 = vst [vmem:[%s161_s23] sm:$0xff] %v168_v4 }
  0x19   : > { %173 = vst [vmem:[%s161_s23 + $0x8] sm:$0xff] %v169_v5 }
  0x1a   : > { %174 = vst [vmem:[%s161_s23 + $0x10] sm:$0xff] %v170_v6 }
  0x1b   : > { %175 = vst [vmem:[%s161_s23 + $0x18] sm:$0xff] %v171_v8 }
  0x1c PF: > { %s20_s15 = sadd.s32 1, %s342_s15   ;;  %s396_s13 = smov %s338_s14 }
  0x1d   : > { %p17_p5 = scmp.ge.s32.totalorder %s20_s15, 4   ;;  %s397_s14 = smov %s399_s0 }
  0x1f   :  { %19 = sbr.rel (!%p17_p5) target bundleno = 8 (0x8), region = 54 }

</bundles_post_ra>
